<compile_context>
chip_gen: v6e
topology: v6e:2x2x1
jax: 0.10.0
libtpu: 0.0.40
codegen_flags: <defaults>
</compile_context>

<pallas_src>
import functools

import jax
import jax.numpy as jnp
import numpy as np
from jax import lax
from jax.experimental import pallas as pl
from jax.experimental.pallas import tpu as pltpu

NUM_CAPSULES = 8
OUT_CHANNELS = 32
KSIZE = 9
STRIDE = 2
N_COLS = OUT_CHANNELS * NUM_CAPSULES  # 256, lane-dense output width


def _primarycaps_kernel(p_ref, w_ref, b_ref, g_ref, o_ref, acc_ref):
    # p_ref: (TM, TK)   im2col patch tile, feature order (kh, kw, c)
    # w_ref: (TK, 256)  fused weight tile of all 8 capsule convs
    # b_ref: (1, 256)   fused biases
    # g_ref: (256, 256) block-diagonal group matrix (blocks of 8)
    # o_ref: (TM, 256)  squashed capsule outputs for these rows
    # acc_ref: (TM, 256) f32 accumulator, resident across the K grid axis
    kk = pl.program_id(1)

    @pl.when(kk == 0)
    def _():
        acc_ref[...] = jnp.zeros_like(acc_ref)

    acc_ref[...] += jnp.dot(p_ref[...], w_ref[...],
                            preferred_element_type=jnp.float32)

    @pl.when(kk == pl.num_programs(1) - 1)
    def _():
        y = acc_ref[...] + b_ref[...]
        # Per-capsule squared norm, broadcast to all 8 columns of each group,
        # computed on the (otherwise idle) MXU instead of an XLU group-reduce.
        sn = jnp.dot(y * y, g_ref[...], preferred_element_type=jnp.float32)
        # squash: (sn/(1+sn)) * u / sqrt(sn) = u * sqrt(sn) / (1+sn)
        v = y * jnp.sqrt(sn) * pl.reciprocal(1.0 + sn, approx=True)
        o_ref[...] = v.astype(o_ref.dtype)


def _im2col_nhwc(x, oh, ow):
    """x: (B, C, H, W) -> patches (B*OH*OW, 81*C), feature order (kh, kw, c)."""
    b, c, _, _ = x.shape
    xt = jnp.transpose(x, (0, 2, 3, 1))                          # (B, H, W, C)
    cols = []
    for kh in range(KSIZE):
        for kw in range(KSIZE):
            sl = xt[:, kh:kh + STRIDE * (oh - 1) + 1:STRIDE,
                       kw:kw + STRIDE * (ow - 1) + 1:STRIDE, :]  # (B, OH, OW, C)
            cols.append(sl)
    p = jnp.concatenate(cols, axis=-1)                           # (B, OH, OW, 81*C)
    return p.reshape(b * oh * ow, KSIZE * KSIZE * c)


def _choose_tiles(m, k, *, tm_max=512, tk_max=2048, vmem_budget=32 << 20):
    """Pick (tm, tk, k_pad) so double-buffered tiles fit the VMEM budget."""
    # --- contraction (K) tiling ---
    if k <= tk_max:
        tk, k_pad = k, k                 # single K block, no 128-alignment needed
    else:
        k_pad = ((k + 127) // 128) * 128
        q = k_pad // 128
        best = 1
        for d in range(1, q + 1):        # largest divisor of q with 128*d <= tk_max
            if q % d == 0 and d * 128 <= tk_max:
                best = d
        tk = best * 128

    # --- row (M) tiling under the budget ---
    resident = (N_COLS * N_COLS + N_COLS) * 4          # G + bias (single-buffered-ish)
    per_ktile = 2 * tk * N_COLS * 4                    # double-buffered weight tile
    per_row = (2 * tk + 2 * N_COLS + N_COLS) * 4       # patch tile + out tile + acc
    cap = (vmem_budget - resident - per_ktile) // per_row
    tm_cap = max(8, min(tm_max, (int(cap) // 8) * 8))

    if m % 8 == 0 and m <= tm_cap:
        tm = m
    elif m % 8 == 0:
        tm = tm_cap
        for cand in range(tm_cap, 7, -8):              # prefer a tile dividing M
            if m % cand == 0:
                tm = cand
                break
    else:
        tm = min(tm_cap, ((m + 7) // 8) * 8)
    return tm, tk, k_pad


@functools.partial(jax.jit, static_argnames=("tm", "tk"))
def primary_caps_forward(x, weights, biases, *, tm=None, tk=None):
    """x: (B, Cin, H, W); weights: (8, 32, Cin, 9, 9); biases: (8, 32).

    Returns squashed capsule vectors of shape (B, 32*PC*PC, 8), PC = (H-9)//2 + 1.
    """
    b, cin, h, w = x.shape
    oh = (h - KSIZE) // STRIDE + 1
    ow = (w - KSIZE) // STRIDE + 1
    k = cin * KSIZE * KSIZE
    n = N_COLS

    patches = _im2col_nhwc(x, oh, ow)                            # (M, K)
    m = patches.shape[0]

    tm_auto, tk_auto, k_pad = _choose_tiles(m, k)
    if tm is None:
        tm = tm_auto
    if tk is None:
        tk = tk_auto
    m_pad = ((m + tm - 1) // tm) * tm

    # Fuse the 8 convs: (kh, kw, cin, out_ch, cap) -> (K, N), col = c_out*8 + cap.
    w_mat = jnp.transpose(weights, (3, 4, 2, 1, 0)).reshape(k, n)
    b_mat = jnp.transpose(biases, (1, 0)).reshape(1, n)

    if m_pad != m or k_pad != k:
        patches = jnp.pad(patches, ((0, m_pad - m), (0, k_pad - k)))
    if k_pad != k:
        w_mat = jnp.pad(w_mat, ((0, k_pad - k), (0, 0)))

    # Block-diagonal group matrix: G[i, j] = 1 iff i // 8 == j // 8.
    idx = jnp.arange(n)
    g_mat = (idx[:, None] // NUM_CAPSULES == idx[None, :] // NUM_CAPSULES
             ).astype(jnp.float32)

    grid = (m_pad // tm, k_pad // tk)
    cost = pl.CostEstimate(
        flops=2 * m_pad * k_pad * n + 2 * m_pad * n * n,
        transcendentals=2 * m_pad * n,
        bytes_accessed=4 * (m_pad * k_pad + (m_pad // tm) * k_pad * n
                            + n * n + n + m_pad * n),
    )

    out = pl.pallas_call(
        _primarycaps_kernel,
        out_shape=jax.ShapeDtypeStruct((m_pad, n), x.dtype),
        grid_spec=pltpu.PrefetchScalarGridSpec(
            num_scalar_prefetch=0,
            grid=grid,
            in_specs=[
                pl.BlockSpec((tm, tk), lambda i, kk: (i, kk)),
                pl.BlockSpec((tk, n), lambda i, kk: (kk, 0)),
                pl.BlockSpec((1, n), lambda i, kk: (0, 0)),
                pl.BlockSpec((n, n), lambda i, kk: (0, 0)),
            ],
            out_specs=pl.BlockSpec((tm, n), lambda i, kk: (i, 0)),
            scratch_shapes=[pltpu.VMEM((tm, n), jnp.float32)],
        ),
        compiler_params=pltpu.CompilerParams(
            dimension_semantics=("parallel", "arbitrary"),
            vmem_limit_bytes=48 * 1024 * 1024,
        ),
        cost_estimate=cost,
    )(patches, w_mat, b_mat, g_mat)

    out = out[:m]                                                # (M, 256)
    out = out.reshape(b, oh, ow, OUT_CHANNELS, NUM_CAPSULES)
    out = out.transpose(0, 3, 1, 2, 4)                           # (B, 32, OH, OW, 8)
    return out.reshape(b, OUT_CHANNELS * oh * ow, NUM_CAPSULES)


def _reference_forward(x, weights, biases):
    """Pure-JAX replica of the PyTorch forward, for verification."""
    b = x.shape[0]
    us = []
    for cap in range(NUM_CAPSULES):
        y = lax.conv_general_dilated(
            x, weights[cap], window_strides=(STRIDE, STRIDE), padding="VALID",
            dimension_numbers=("NCHW", "OIHW", "NCHW"))
        y = y + biases[cap][None, :, None, None]
        us.append(y.reshape(b, -1, 1))
    u = jnp.concatenate(us, axis=-1)
    sn = jnp.sum(u * u, axis=-1, keepdims=True)
    return (sn / (1.0 + sn)) * u / jnp.sqrt(sn)


if __name__ == "__main__":
    # Small shapes consistent with the module: args.nFilters=4, input 16x16
    # -> PC = (16-9)//2 + 1 = 4 = args.PCchannels, output (2, 32*4*4, 8).
    key = jax.random.PRNGKey(0)
    kx, kw, kb = jax.random.split(key, 3)

    B, CIN, H, W = 2, 4, 16, 16
    x = jax.random.normal(kx, (B, CIN, H, W), dtype=jnp.float32)
    weights = 0.1 * jax.random.normal(
        kw, (NUM_CAPSULES, OUT_CHANNELS, CIN, KSIZE, KSIZE), dtype=jnp.float32)
    biases = 0.1 * jax.random.normal(kb, (NUM_CAPSULES, OUT_CHANNELS), dtype=jnp.float32)

    out = primary_caps_forward(x, weights, biases)
    out = jax.block_until_ready(out)

    ref = jax.block_until_ready(_reference_forward(x, weights, biases))
    assert out.shape == (B, OUT_CHANNELS * 4 * 4, NUM_CAPSULES), out.shape
    np.testing.assert_allclose(np.asarray(out), np.asarray(ref), rtol=2e-3, atol=2e-3)

    print("KERNEL_OK")
</pallas_src>

<mosaic_0001>
module attributes {stable_mosaic.version = 11 : i64} {
  func.func @_primarycaps_kernel(%arg0: i32, %arg1: i32, %arg2: memref<32x324xf32, #tpu.memory_space<vmem>>, %arg3: memref<324x256xf32, #tpu.memory_space<vmem>>, %arg4: memref<1x256xf32, #tpu.memory_space<vmem>>, %arg5: memref<256x256xf32, #tpu.memory_space<vmem>>, %arg6: memref<32x256xf32, #tpu.memory_space<vmem>>, %arg7: memref<32x256xf32, #tpu.memory_space<vmem>>) attributes {dimension_semantics = [#tpu.dimension_semantics<parallel>, #tpu.dimension_semantics<arbitrary>], iteration_bounds = array<i64: 1, 1>, scalar_prefetch = 0 : i64, scratch_operands = 1 : i64, tpu.core_type = #tpu.core_type<tc>, window_params = [{transform_indices = @transform_0, window_bounds = array<i64: 32, 324>}, {transform_indices = @transform_1, window_bounds = array<i64: 324, 256>}, {pipeline_mode = #tpu.pipeline_mode<synchronous>, transform_indices = @transform_2, window_bounds = array<i64: 1, 256>}, {pipeline_mode = #tpu.pipeline_mode<synchronous>, transform_indices = @transform_3, window_bounds = array<i64: 256, 256>}, {transform_indices = @transform_4, window_bounds = array<i64: 32, 256>}]} {
    %c0_i32 = arith.constant 0 : i32
    %0 = arith.cmpi eq, %arg1, %c0_i32 : i32
    %1 = arith.extui %0 : i1 to i32
    %c0_i32_0 = arith.constant 0 : i32
    %2 = arith.cmpi ne, %1, %c0_i32_0 : i32
    scf.if %2 {
      %cst_10 = arith.constant 0.000000e+00 : f32
      %12 = vector.broadcast %cst_10 : f32 to vector<32x256xf32>
      %c0_11 = arith.constant 0 : index
      %c0_12 = arith.constant 0 : index
      %13 = vector.load %arg7[%c0_11, %c0_12] : memref<32x256xf32, #tpu.memory_space<vmem>>, vector<32x256xf32>
      tpu.vector_store %arg7[%c0_11, %c0_12], %12 {strides = array<i32>} : memref<32x256xf32, #tpu.memory_space<vmem>>, vector<32x256xf32>,
    } else {
    }
    %c0 = arith.constant 0 : index
    %c0_1 = arith.constant 0 : index
    %3 = vector.load %arg7[%c0, %c0_1] : memref<32x256xf32, #tpu.memory_space<vmem>>, vector<32x256xf32>
    %c0_2 = arith.constant 0 : index
    %c0_3 = arith.constant 0 : index
    %4 = vector.load %arg2[%c0_2, %c0_3] : memref<32x324xf32, #tpu.memory_space<vmem>>, vector<32x324xf32>
    %c0_4 = arith.constant 0 : index
    %c0_5 = arith.constant 0 : index
    %5 = vector.load %arg3[%c0_4, %c0_5] : memref<324x256xf32, #tpu.memory_space<vmem>>, vector<324x256xf32>
    %cst = arith.constant dense<0.000000e+00> : vector<32x256xf32>
    %6 = tpu.matmul %4, %5, %cst {dimension_numbers = #tpu.dot_dimension_numbers<[1], [0], [0], [1], [0, 0, 1, 1], [], []>} : vector<32x324xf32>, vector<324x256xf32>, vector<32x256xf32> -> vector<32x256xf32>
    %7 = arith.addf %3, %6 : vector<32x256xf32>
    %c0_6 = arith.constant 0 : index
    %c0_7 = arith.constant 0 : index
    %8 = vector.load %arg7[%c0_6, %c0_7] : memref<32x256xf32, #tpu.memory_space<vmem>>, vector<32x256xf32>
    tpu.vector_store %arg7[%c0_6, %c0_7], %7 {strides = array<i32>} : memref<32x256xf32, #tpu.memory_space<vmem>>, vector<32x256xf32>,
    %c0_i32_8 = arith.constant 0 : i32
    %9 = arith.cmpi eq, %arg1, %c0_i32_8 : i32
    %10 = arith.extui %9 : i1 to i32
    %c0_i32_9 = arith.constant 0 : i32
    %11 = arith.cmpi ne, %10, %c0_i32_9 : i32
    scf.if %11 {
      %c0_10 = arith.constant 0 : index
      %c0_11 = arith.constant 0 : index
      %12 = vector.load %arg7[%c0_10, %c0_11] : memref<32x256xf32, #tpu.memory_space<vmem>>, vector<32x256xf32>
      %c0_12 = arith.constant 0 : index
      %c0_13 = arith.constant 0 : index
      %13 = vector.load %arg4[%c0_12, %c0_13] : memref<1x256xf32, #tpu.memory_space<vmem>>, vector<1x256xf32>
      %14 = vector.broadcast %13 : vector<1x256xf32> to vector<32x256xf32>
      %15 = arith.addf %12, %14 : vector<32x256xf32>
      %16 = arith.mulf %15, %15 : vector<32x256xf32>
      %c0_14 = arith.constant 0 : index
      %c0_15 = arith.constant 0 : index
      %17 = vector.load %arg5[%c0_14, %c0_15] : memref<256x256xf32, #tpu.memory_space<vmem>>, vector<256x256xf32>
      %cst_16 = arith.constant dense<0.000000e+00> : vector<32x256xf32>
      %18 = tpu.matmul %16, %17, %cst_16 {dimension_numbers = #tpu.dot_dimension_numbers<[1], [0], [0], [1], [0, 0, 1, 1], [], []>} : vector<32x256xf32>, vector<256x256xf32>, vector<32x256xf32> -> vector<32x256xf32>
      %19 = math.sqrt %18 : vector<32x256xf32>
      %20 = arith.mulf %15, %19 : vector<32x256xf32>
      %cst_17 = arith.constant 1.000000e+00 : f32
      %21 = vector.broadcast %cst_17 : f32 to vector<32x256xf32>
      %22 = arith.addf %21, %18 : vector<32x256xf32>
      %23 = tpu.reciprocal %22 {approx = true} : vector<32x256xf32> -> vector<32x256xf32>
      %24 = arith.mulf %20, %23 : vector<32x256xf32>
      %c0_18 = arith.constant 0 : index
      %c0_19 = arith.constant 0 : index
      %25 = vector.load %arg6[%c0_18, %c0_19] : memref<32x256xf32, #tpu.memory_space<vmem>>, vector<32x256xf32>
      tpu.vector_store %arg6[%c0_18, %c0_19], %24 {strides = array<i32>} : memref<32x256xf32, #tpu.memory_space<vmem>>, vector<32x256xf32>,
    } else {
    }
    return
  }
  func.func @transform_0(%arg0: i32, %arg1: i32) -> (i32, i32) {
    %c0_i32 = arith.constant 0 : i32
    return %arg0, %arg1 : i32, i32
  }
  func.func @transform_1(%arg0: i32, %arg1: i32) -> (i32, i32) {
    %c0_i32 = arith.constant 0 : i32
    %c0_i32_0 = arith.constant 0 : i32
    return %arg1, %c0_i32 : i32, i32
  }
  func.func @transform_2(%arg0: i32, %arg1: i32) -> (i32, i32) {
    %c0_i32 = arith.constant 0 : i32
    %c0_i32_0 = arith.constant 0 : i32
    %c0_i32_1 = arith.constant 0 : i32
    return %c0_i32, %c0_i32_0 : i32, i32
  }
  func.func @transform_3(%arg0: i32, %arg1: i32) -> (i32, i32) {
    %c0_i32 = arith.constant 0 : i32
    %c0_i32_0 = arith.constant 0 : i32
    %c0_i32_1 = arith.constant 0 : i32
    return %c0_i32, %c0_i32_0 : i32, i32
  }
  func.func @transform_4(%arg0: i32, %arg1: i32) -> (i32, i32) {
    %c0_i32 = arith.constant 0 : i32
    %c0_i32_0 = arith.constant 0 : i32
    return %arg0, %c0_i32 : i32, i32
  }
}

</mosaic_0001>

<bundles_post_ra>
// kernel: primary_caps_forward.1
= control target key start
LH: loop header
LB: loop body
LE: loop exit
PB: predicated region body
PF: predicated region fallthrough
CT: control target
= control target key end

     0   :  { %v676_v3 = vmov 0.0   ;;  %vm144_vm0 = vcmask 1043456   ;;  %vm131_vm1 = vcmask 556032   ;;  %s1296_s1 = inlined_call_operand.vmem [shape: f32[324,256], index: 1, kind: input, shape index: {}]   ;;  %s1297_s0 = inlined_call_operand.vmem [shape: f32[32,324], index: 0, kind: input, shape index: {}]   ;;  %s1298_s3 = inlined_call_operand.vmem [shape: f32[256,256], index: 3, kind: input, shape index: {}]   ;;  %s1299_s2 = inlined_call_operand.vmem [shape: f32[1,256], index: 2, kind: input, shape index: {}]   ;;  %s1300_s4 = inlined_call_operand.vmem [shape: f32[32,256], index: 4, kind: output, shape index: {}]  }
   0x1   :  { %v80_v0 = vld [vmem:[%s1296_s1 + $0xf8] sm:$0xff]  ;;  %v79_v1 = vld [vmem:[%s1296_s1 + $0xf0] sm:$0xff]  ;;  %v78_v2 = vld [vmem:[%s1296_s1 + $0xe8] sm:$0xff]  ;;  %304 = vmatprep.mubr.f32.mxu1 %v676_v3 }
   0x2   :  { %151 = vmatprep.subr.mxu0 %v80_v0  ;;  %v77_v4 = vld [vmem:[%s1296_s1 + $0xe0] sm:$0xff]  ;;  %v76_v5 = vld [vmem:[%s1296_s1 + $0xd8] sm:$0xff]  ;;  %v75_v6 = vld [vmem:[%s1296_s1 + $0xd0] sm:$0xff] }
   0x3   :  { %152 = vmatpush1.msra.mxu0 %v79_v1  ;;  %v74_v7 = vld [vmem:[%s1296_s1 + $0xc8] sm:$0xff]  ;;  %v73_v8 = vld [vmem:[%s1296_s1 + $0xc0] sm:$0xff]  ;;  %v72_v9 = vld [vmem:[%s1296_s1 + $0xb8] sm:$0xff] }
   0x4   :  { %153 = vmatprep.subr.mxu0 %v78_v2  ;;  %v71_v10 = vld [vmem:[%s1296_s1 + $0xb0] sm:$0xff]  ;;  %v70_v11 = vld [vmem:[%s1296_s1 + $0xa8] sm:$0xff]  ;;  %v69_v12 = vld [vmem:[%s1296_s1 + $0xa0] sm:$0xff] }
   0x5   :  { %154 = vmatpush1.msra.mxu0 %v77_v4  ;;  %v68_v13 = vld [vmem:[%s1296_s1 + $0x98] sm:$0xff]  ;;  %v67_v14 = vld [vmem:[%s1296_s1 + $0x90] sm:$0xff]  ;;  %v66_v15 = vld [vmem:[%s1296_s1 + $0x88] sm:$0xff] }
   0x6   :  { %155 = vmatprep.subr.mxu0 %v76_v5  ;;  %v65_v16 = vld [vmem:[%s1296_s1 + $0x80] sm:$0xff]  ;;  %v64_v17 = vld [vmem:[%s1296_s1 + $0x78] sm:$0xff]  ;;  %v63_v18 = vld [vmem:[%s1296_s1 + $0x70] sm:$0xff] }
   0x7   :  { %156 = vmatpush1.msra.mxu0 %v75_v6  ;;  %v130_v19 = vld [vmem:[%s1296_s1 + $0x288] sm:$0xf]  ;;  %v129_v20 = vld [vmem:[%s1296_s1 + $0x280] sm:$0xf]  ;;  %v128_v22 = vld [vmem:[%s1296_s1 + $0x278] sm:$0xff] }
   0x8   :  { %157 = vmatprep.subr.mxu0 %v74_v7  ;;  %v62_v21 = vld [vmem:[%s1296_s1 + $0x68] sm:$0xff]  ;;  %637 = vmatprep.subr.msk.mxu1 %vm144_vm0, %v130_v19  ;;  %v61_v23 = vld [vmem:[%s1296_s1 + $0x60] sm:$0xff]  ;;  %v127_v24 = vld [vmem:[%s1296_s1 + $0x270] sm:$0xff] }
   0x9   :  { %158 = vmatpush1.msra.mxu0 %v73_v8  ;;  %638 = vmatpush1.msk.msra.mxu1 %vm144_vm0, %v129_v20  ;;  %v126_v25 = vld [vmem:[%s1296_s1 + $0x268] sm:$0xff]  ;;  %v60_v26 = vld [vmem:[%s1296_s1 + $0x58] sm:$0xff]  ;;  %v125_v27 = vld [vmem:[%s1296_s1 + $0x260] sm:$0xff] }
   0xa   :  { %159 = vmatprep.subr.mxu0 %v72_v9  ;;  %256 = vmatprep.subr.mxu1 %v128_v22  ;;  %v59_v28 = vld [vmem:[%s1296_s1 + $0x50] sm:$0xff]  ;;  %v124_v29 = vld [vmem:[%s1296_s1 + $0x258] sm:$0xff]  ;;  %v58_v30 = vld [vmem:[%s1296_s1 + $0x48] sm:$0xff] }
   0xb   :  { %160 = vmatpush1.msra.mxu0 %v71_v10  ;;  %257 = vmatpush1.msra.mxu1 %v127_v24  ;;  %v123_v31 = vld [vmem:[%s1296_s1 + $0x250] sm:$0xff]  ;;  %v57_v32 = vld [vmem:[%s1296_s1 + $0x40] sm:$0xff]  ;;  %v122_v33 = vld [vmem:[%s1296_s1 + $0x248] sm:$0xff] }
   0xc   :  { %161 = vmatprep.subr.mxu0 %v70_v11  ;;  %258 = vmatprep.subr.mxu1 %v126_v25  ;;  %v56_v34 = vld [vmem:[%s1296_s1 + $0x38] sm:$0xff]  ;;  %v121_v35 = vld [vmem:[%s1296_s1 + $0x240] sm:$0xff]  ;;  %v55_v36 = vld [vmem:[%s1296_s1 + $0x30] sm:$0xff] }
   0xd   :  { %162 = vmatpush1.msra.mxu0 %v69_v12  ;;  %259 = vmatpush1.msra.mxu1 %v125_v27  ;;  %v120_v37 = vld [vmem:[%s1296_s1 + $0x238] sm:$0xff]  ;;  %v54_v38 = vld [vmem:[%s1296_s1 + $0x28] sm:$0xff]  ;;  %v119_v39 = vld [vmem:[%s1296_s1 + $0x230] sm:$0xff] }
   0xe   :  { %163 = vmatprep.subr.mxu0 %v68_v13  ;;  %260 = vmatprep.subr.mxu1 %v124_v29  ;;  %v53_v40 = vld [vmem:[%s1296_s1 + $0x20] sm:$0xff]  ;;  %v118_v41 = vld [vmem:[%s1296_s1 + $0x228] sm:$0xff]  ;;  %v52_v42 = vld [vmem:[%s1296_s1 + $0x18] sm:$0xff] }
   0xf   :  { %164 = vmatpush1.msra.mxu0 %v67_v14  ;;  %261 = vmatpush1.msra.mxu1 %v123_v31  ;;  %v117_v43 = vld [vmem:[%s1296_s1 + $0x220] sm:$0xff]  ;;  %v51_v44 = vld [vmem:[%s1296_s1 + $0x10] sm:$0xff]  ;;  %v116_v45 = vld [vmem:[%s1296_s1 + $0x218] sm:$0xff] }
  0x10   :  { %165 = vmatprep.subr.mxu0 %v66_v15  ;;  %262 = vmatprep.subr.mxu1 %v122_v33  ;;  %v50_v46 = vld [vmem:[%s1296_s1 + $0x8] sm:$0xff]  ;;  %v115_v47 = vld [vmem:[%s1296_s1 + $0x210] sm:$0xff]  ;;  %v49_v48 = vld [vmem:[%s1296_s1] sm:$0xff] }
  0x11   :  { %166 = vmatpush1.msra.mxu0 %v65_v16  ;;  %263 = vmatpush1.msra.mxu1 %v121_v35  ;;  %v114_v49 = vld [vmem:[%s1296_s1 + $0x208] sm:$0xff]  ;;  %v112_v50 = vld [vmem:[%s1296_s1 + $0x1f8] sm:$0xff]  ;;  %v113_v51 = vld [vmem:[%s1296_s1 + $0x200] sm:$0xff] }
  0x12   :  { %167 = vmatprep.subr.mxu0 %v64_v17  ;;  %264 = vmatprep.subr.mxu1 %v120_v37  ;;  %v111_v52 = vld [vmem:[%s1296_s1 + $0x1f0] sm:$0xff]  ;;  %v110_v54 = vld [vmem:[%s1296_s1 + $0x1e8] sm:$0xff]  ;;  %v109_v56 = vld [vmem:[%s1296_s1 + $0x1e0] sm:$0xff] }
  0x13   :  { %168 = vmatpush1.msra.mxu0 %v63_v18  ;;  %265 = vmatpush1.msra.mxu1 %v119_v39  ;;  %v39_v53 = vld [vmem:[%s1297_s0 + $0x10] sm:$0xff]  ;;  %v38_v55 = vld [vmem:[%s1297_s0 + $0x8] sm:$0xff]  ;;  %v108_v57 = vld [vmem:[%s1296_s1 + $0x1d8] sm:$0xff] }
  0x14   :  { %169 = vmatprep.subr.mxu0 %v62_v21  ;;  %266 = vmatprep.subr.mxu1 %v118_v41  ;;  %v415_v58 = vld [vmem:[%s1298_s3 + $0xf8] sm:$0xff]  ;;  %v107_v59 = vld [vmem:[%s1296_s1 + $0x1d0] sm:$0xff]  ;;  %v42_v60 = vld [vmem:[%s1297_s0 + $0x28] sm:$0xff] }
  0x15   :  { %170 = vmatpush1.msra.mxu0 %v61_v23  ;;  %267 = vmatpush1.msra.mxu1 %v117_v43  ;;  %v106_v61 = vld [vmem:[%s1296_s1 + $0x1c8] sm:$0xff]  ;;  %v105_v62 = vld [vmem:[%s1296_s1 + $0x1c0] sm:$0xff]  ;;  %v414_v63 = vld [vmem:[%s1298_s3 + $0xf0] sm:$0xff] }
  0x16   :  { %171 = vmatprep.subr.mxu0 %v60_v26  ;;  %268 = vmatprep.subr.mxu1 %v116_v45  ;;  %v104_v0 = vld [vmem:[%s1296_s1 + $0x1b8] sm:$0xff]  ;;  %v413_v1 = vld [vmem:[%s1298_s3 + $0xe8] sm:$0xff]  ;;  %v103_v2 = vld [vmem:[%s1296_s1 + $0x1b0] sm:$0xff] }
  0x17   :  { %172 = vmatpush1.msra.mxu0 %v59_v28  ;;  %269 = vmatpush1.msra.mxu1 %v115_v47  ;;  %v45_v4 = vld [vmem:[%s1297_s0 + $0x40] sm:$0xff]  ;;  %v102_v5 = vld [vmem:[%s1296_s1 + $0x1a8] sm:$0xff]  ;;  %v100_v8 = vld [vmem:[%s1296_s1 + $0x198] sm:$0xff] }
  0x18   :  { %173 = vmatprep.subr.mxu0 %v58_v30  ;;  %270 = vmatprep.subr.mxu1 %v114_v49  ;;  %v101_v6 = vld [vmem:[%s1296_s1 + $0x1a0] sm:$0xff]  ;;  %v411_v9 = vld [vmem:[%s1298_s3 + $0xd8] sm:$0xff]  ;;  %v99_v10 = vld [vmem:[%s1296_s1 + $0x190] sm:$0xff] }
  0x19   :  { %174 = vmatpush1.msra.mxu0 %v57_v32  ;;  %271 = vmatpush1.msra.mxu1 %v113_v51  ;;  %v412_v7 = vld [vmem:[%s1298_s3 + $0xe0] sm:$0xff]  ;;  %v48_v11 = vld [vmem:[%s1297_s0 + $0x58] sm:$0xff]  ;;  %v98_v12 = vld [vmem:[%s1296_s1 + $0x188] sm:$0xff] }
  0x1a   :  { %175 = vmatprep.subr.mxu0 %v56_v34  ;;  %639 = vmatmul.mubr.msk.f32.vlgmr.msra.gmra.mxu1 %vm131_vm1, %v39_v53  ;;  %v410_v13 = vld [vmem:[%s1298_s3 + $0xd0] sm:$0xff]  ;;  %v97_v14 = vld [vmem:[%s1296_s1 + $0x180] sm:$0xff]  ;;  %v96_v15 = vld [vmem:[%s1296_s1 + $0x178] sm:$0xff] }
  0x1b   :  { %176 = vmatpush1.msra.mxu0 %v55_v36  ;;  %215 = vmatprep.mubr.f32.mxu0 %v38_v55  ;;  %v408_v16 = vld [vmem:[%s1298_s3 + $0xc0] sm:$0xff]  ;;  %v95_v17 = vld [vmem:[%s1296_s1 + $0x170] sm:$0xff]  ;;  %v407_v18 = vld [vmem:[%s1298_s3 + $0xb8] sm:$0xff] }
  0x1c   :  { %177 = vmatprep.subr.mxu0 %v54_v38  ;;  %310 = vmatprep.mubr.f32.mxu1 %v676_v3  ;;  %v94_v19 = vld [vmem:[%s1296_s1 + $0x168] sm:$0xff]  ;;  %v406_v20 = vld [vmem:[%s1298_s3 + $0xb0] sm:$0xff]  ;;  %v93_v21 = vld [vmem:[%s1296_s1 + $0x160] sm:$0xff] }
  0x1d   :  { %178 = vmatpush1.msra.mxu0 %v53_v40  ;;  %448 = vmatprep.subr.mxu1 %v415_v58  ;;  %v405_v22 = vld [vmem:[%s1298_s3 + $0xa8] sm:$0xff]  ;;  %v92_v23 = vld [vmem:[%s1296_s1 + $0x158] sm:$0xff]  ;;  %v404_v24 = vld [vmem:[%s1298_s3 + $0xa0] sm:$0xff] }
  0x1e   :  { %179 = vmatprep.subr.mxu0 %v52_v42  ;;  %640 = vmatmul.mubr.msk.f32.gmra.mxu1 %vm131_vm1, %v42_v60  ;;  %v91_v25 = vld [vmem:[%s1296_s1 + $0x150] sm:$0xff]  ;;  %v403_v26 = vld [vmem:[%s1298_s3 + $0x98] sm:$0xff]  ;;  %v90_v27 = vld [vmem:[%s1296_s1 + $0x148] sm:$0xff] }
  0x1f   :  { %180 = vmatpush1.msra.mxu0 %v51_v44  ;;  %316 = vmatprep.mubr.f32.mxu1 %v676_v3  ;;  %v402_v28 = vld [vmem:[%s1298_s3 + $0x90] sm:$0xff]  ;;  %v89_v29 = vld [vmem:[%s1296_s1 + $0x140] sm:$0xff]  ;;  %v401_v30 = vld [vmem:[%s1298_s3 + $0x88] sm:$0xff] }
  0x20   :  { %181 = vmatprep.subr.mxu0 %v50_v46  ;;  %449 = vmatpush1.msra.mxu1 %v414_v63  ;;  %v88_v31 = vld [vmem:[%s1296_s1 + $0x138] sm:$0xff]  ;;  %v400_v32 = vld [vmem:[%s1298_s3 + $0x80] sm:$0xff]  ;;  %v87_v33 = vld [vmem:[%s1296_s1 + $0x130] sm:$0xff] }
  0x21   :  { %182 = vmatpush1.msra.mxu0 %v49_v48  ;;  %450 = vmatprep.subr.mxu1 %v413_v1  ;;  %v399_v34 = vld [vmem:[%s1298_s3 + $0x78] sm:$0xff]  ;;  %v86_v35 = vld [vmem:[%s1296_s1 + $0x128] sm:$0xff]  ;;  %v398_v36 = vld [vmem:[%s1298_s3 + $0x70] sm:$0xff] }
  0x22   :  { %183 = vmatprep.subr.mxu0 %v112_v50  ;;  %641 = vmatmul.mubr.msk.f32.gmra.mxu1 %vm131_vm1, %v45_v4  ;;  %v85_v37 = vld [vmem:[%s1296_s1 + $0x120] sm:$0xff]  ;;  %v397_v38 = vld [vmem:[%s1298_s3 + $0x68] sm:$0xff]  ;;  %v84_v39 = vld [vmem:[%s1296_s1 + $0x118] sm:$0xff] }
  0x23   :  { %184 = vmatpush2.msra.mxu0 %v111_v52  ;;  %322 = vmatprep.mubr.f32.mxu1 %v676_v3  ;;  %v409_v3 = vld [vmem:[%s1298_s3 + $0xc8] sm:$0xff]  ;;  %v396_v40 = vld [vmem:[%s1298_s3 + $0x60] sm:$0xff]  ;;  %v83_v41 = vld [vmem:[%s1296_s1 + $0x110] sm:$0xff] }
  0x24   :  { %185 = vmatprep.subr.mxu0 %v110_v54  ;;  %451 = vmatpush1.msra.mxu1 %v412_v7  ;;  %v395_v42 = vld [vmem:[%s1298_s3 + $0x58] sm:$0xff]  ;;  %v82_v43 = vld [vmem:[%s1296_s1 + $0x108] sm:$0xff]  ;;  %v394_v44 = vld [vmem:[%s1298_s3 + $0x50] sm:$0xff] }
  0x25   :  { %186 = vmatpush2.msra.mxu0 %v109_v56  ;;  %452 = vmatprep.subr.mxu1 %v411_v9  ;;  %v81_v45 = vld [vmem:[%s1296_s1 + $0x100] sm:$0xff]  ;;  %v393_v46 = vld [vmem:[%s1298_s3 + $0x48] sm:$0xff]  ;;  %v391_v50 = vld [vmem:[%s1298_s3 + $0x38] sm:$0xff] }
  0x26   :  { %187 = vmatprep.subr.mxu0 %v108_v57  ;;  %642 = vmatmul.mubr.msk.f32.gmra.mxu1 %vm131_vm1, %v48_v11  ;;  %v37_v47 = vld [vmem:[%s1297_s0] sm:$0xff]  ;;  %v390_v51 = vld [vmem:[%s1298_s3 + $0x30] sm:$0xff]  ;;  %v389_v52 = vld [vmem:[%s1298_s3 + $0x28] sm:$0xff] }
  0x27   :  { %188 = vmatpush2.msra.mxu0 %v107_v59  ;;  %453 = vmatpush1.msra.mxu1 %v410_v13  ;;  %v392_v48 = vld [vmem:[%s1298_s3 + $0x40] sm:$0xff]  ;;  %v40_v53 = vld [vmem:[%s1297_s0 + $0x18] sm:$0xff]  ;;  %v386_v57 = vld [vmem:[%s1298_s3 + $0x10] sm:$0xff] }
  0x28   :  { %189 = vmatprep.subr.mxu0 %v106_v61  ;;  %454 = vmatprep.subr.mxu1 %v409_v3  ;;  %v41_v49 = vld [vmem:[%s1297_s0 + $0x20] sm:$0xff]  ;;  %v44_v55 = vld [vmem:[%s1297_s0 + $0x38] sm:$0xff]  ;;  %v385_v58 = vld [vmem:[%s1298_s3 + $0x8] sm:$0xff] }
  0x29   :  { %190 = vmatpush2.msra.mxu0 %v105_v62  ;;  %455 = vmatpush1.msra.mxu1 %v408_v16  ;;  %v388_v54 = vld [vmem:[%s1298_s3 + $0x20] sm:$0xff]  ;;  %v387_v56 = vld [vmem:[%s1298_s3 + $0x18] sm:$0xff]  ;;  %v43_v59 = vld [vmem:[%s1297_s0 + $0x30] sm:$0xff] }
  0x2a   :  { %191 = vmatprep.subr.mxu0 %v104_v0  ;;  %456 = vmatprep.subr.mxu1 %v407_v18  ;;  %v384_v60 = vld [vmem:[%s1298_s3] sm:$0xff]  ;;  %v47_v61 = vld [vmem:[%s1297_s0 + $0x50] sm:$0xff]  ;;  %v447_v62 = vld [vmem:[%s1298_s3 + $0x1f8] sm:$0xff] }
  0x2b   :  { %192 = vmatpush2.msra.mxu0 %v103_v2  ;;  %457 = vmatpush1.msra.mxu1 %v406_v20  ;;  %v446_v63 = vld [vmem:[%s1298_s3 + $0x1f0] sm:$0xff]  ;;  %v445_v0 = vld [vmem:[%s1298_s3 + $0x1e8] sm:$0xff]  ;;  %v444_v2 = vld [vmem:[%s1298_s3 + $0x1e0] sm:$0xff] }
  0x2c   :  { %193 = vmatprep.subr.mxu0 %v102_v5  ;;  %458 = vmatprep.subr.mxu1 %v405_v22  ;;  %v46_v1 = vld [vmem:[%s1297_s0 + $0x48] sm:$0xff]  ;;  %v443_v4 = vld [vmem:[%s1298_s3 + $0x1d8] sm:$0xff]  ;;  %v442_v5 = vld [vmem:[%s1298_s3 + $0x1d0] sm:$0xff] }
  0x2d   :  { %194 = vmatpush2.msra.mxu0 %v101_v6  ;;  %459 = vmatpush1.msra.mxu1 %v404_v24  ;;  %v441_v6 = vld [vmem:[%s1298_s3 + $0x1c8] sm:$0xff]  ;;  %v440_v7 = vld [vmem:[%s1298_s3 + $0x1c0] sm:$0xff]  ;;  %v438_v9 = vld [vmem:[%s1298_s3 + $0x1b0] sm:$0xff] }
  0x2e   :  { %195 = vmatprep.subr.mxu0 %v100_v8  ;;  %460 = vmatprep.subr.mxu1 %v403_v26  ;;  %v439_v8 = vld [vmem:[%s1298_s3 + $0x1b8] sm:$0xff]  ;;  %v436_v11 = vld [vmem:[%s1298_s3 + $0x1a0] sm:$0xff]  ;;  %v434_v13 = vld [vmem:[%s1298_s3 + $0x190] sm:$0xff] }
  0x2f   :  { %196 = vmatpush2.msra.mxu0 %v99_v10  ;;  %461 = vmatpush1.msra.mxu1 %v402_v28  ;;  %v437_v10 = vld [vmem:[%s1298_s3 + $0x1a8] sm:$0xff]  ;;  %v432_v3 = vld [vmem:[%s1298_s3 + $0x180] sm:$0xff]  ;;  %v430_v16 = vld [vmem:[%s1298_s3 + $0x170] sm:$0xff] }
  0x30   :  { %197 = vmatprep.subr.mxu0 %v98_v12  ;;  %462 = vmatprep.subr.mxu1 %v401_v30  ;;  %v435_v12 = vld [vmem:[%s1298_s3 + $0x198] sm:$0xff]  ;;  %v428_v18 = vld [vmem:[%s1298_s3 + $0x160] sm:$0xff]  ;;  %v426_v20 = vld [vmem:[%s1298_s3 + $0x150] sm:$0xff] }
  0x31   :  { %198 = vmatpush2.msra.mxu0 %v97_v14  ;;  %463 = vmatpush1.msra.mxu1 %v400_v32  ;;  %v433_v14 = vld [vmem:[%s1298_s3 + $0x188] sm:$0xff]  ;;  %v424_v22 = vld [vmem:[%s1298_s3 + $0x140] sm:$0xff]  ;;  %v422_v24 = vld [vmem:[%s1298_s3 + $0x130] sm:$0xff]  ;;  %v358_v32 = vlaneseq }
  0x32   :  { %199 = vmatprep.subr.mxu0 %v96_v15  ;;  %464 = vmatprep.subr.mxu1 %v399_v34  ;;  %v431_v15 = vld [vmem:[%s1298_s3 + $0x178] sm:$0xff]  ;;  %v420_v26 = vld [vmem:[%s1298_s3 + $0x120] sm:$0xff]  ;;  %v418_v28 = vld [vmem:[%s1298_s3 + $0x110] sm:$0xff] }
  0x33   :  { %200 = vmatpush2.msra.mxu0 %v95_v17  ;;  %465 = vmatpush1.msra.mxu1 %v398_v36  ;;  %v429_v17 = vld [vmem:[%s1298_s3 + $0x168] sm:$0xff]  ;;  %v416_v30 = vld [vmem:[%s1298_s3 + $0x100] sm:$0xff]  ;;  %v359_v34 = vshrl.u32 %v358_v32, 7 }
  0x34   :  { %201 = vmatprep.subr.mxu0 %v94_v19  ;;  %466 = vmatprep.subr.mxu1 %v397_v38  ;;  %v427_v19 = vld [vmem:[%s1298_s3 + $0x158] sm:$0xff] }
  0x35   :  { %202 = vmatpush2.msra.mxu0 %v93_v21  ;;  %467 = vmatpush1.msra.mxu1 %v396_v40  ;;  %v425_v21 = vld [vmem:[%s1298_s3 + $0x148] sm:$0xff]  ;;  %v360_v36 = vsub.s32 0, %v359_v34  ;;  %v364_v38 = vsub.s32 1, %v359_v34 }
  0x36   :  { %203 = vmatprep.subr.mxu0 %v92_v23  ;;  %468 = vmatprep.subr.mxu1 %v395_v42  ;;  %v423_v23 = vld [vmem:[%s1298_s3 + $0x138] sm:$0xff] }
  0x37   :  { %204 = vmatpush2.msra.mxu0 %v91_v25  ;;  %469 = vmatpush1.msra.mxu1 %v394_v44  ;;  %v421_v25 = vld [vmem:[%s1298_s3 + $0x128] sm:$0xff] }
  0x38   :  { %205 = vmatprep.subr.mxu0 %v90_v27  ;;  %470 = vmatprep.subr.mxu1 %v393_v46  ;;  %v419_v27 = vld [vmem:[%s1298_s3 + $0x118] sm:$0xff] }
  0x39   :  { %206 = vmatpush2.msra.mxu0 %v89_v29  ;;  %471 = vmatpush1.msra.mxu1 %v392_v48  ;;  %v417_v29 = vld [vmem:[%s1298_s3 + $0x108] sm:$0xff] }
  0x3a   :  { %207 = vmatprep.subr.mxu0 %v88_v31  ;;  %472 = vmatprep.subr.mxu1 %v391_v50 }
  0x3b   :  { %208 = vmatpush2.msra.mxu0 %v87_v33  ;;  %473 = vmatpush1.msra.mxu1 %v390_v51 }
  0x3c   :  { %209 = vmatprep.subr.mxu0 %v86_v35  ;;  %474 = vmatprep.subr.mxu1 %v389_v52 }
  0x3d   :  { %210 = vmatpush2.msra.mxu0 %v85_v37  ;;  %475 = vmatpush1.msra.mxu1 %v388_v54  ;;  %v356_v37 = vld [vmem:[%s1299_s2] sm:$0x3] }
  0x3e   :  { %211 = vmatprep.subr.mxu0 %v84_v39  ;;  %476 = vmatprep.subr.mxu1 %v387_v56 }
  0x3f   :  { %212 = vmatpush2.msra.mxu0 %v83_v41  ;;  %477 = vmatpush1.msra.mxu1 %v386_v57  ;;  %v361_v41 = vrot.slane %v356_v37, %v360_v36 }
  0x40   :  { %213 = vmatprep.subr.mxu0 %v82_v43  ;;  %478 = vmatprep.subr.mxu1 %v385_v58  ;;  %v365_v43 = vrot.slane %v356_v37, %v364_v38 }
  0x41   :  { %214 = vmatpush2.msra.mxu0 %v81_v45  ;;  %479 = vmatpush1.msra.mxu1 %v384_v60 }
  0x42   :  { %216 = vmatmul.mubr.f32.vlgmr.msra.gmra.mxu0 %v37_v47  ;;  %480 = vmatprep.subr.mxu1 %v447_v62 }
  0x43   :  { %221 = vmatprep.mubr.f32.mxu0 %v41_v49  ;;  %481 = vmatpush2.msra.mxu1 %v446_v63 }
  0x44   :  { %482 = vmatprep.subr.mxu1 %v445_v0 }
  0x45   :  { %483 = vmatpush2.msra.mxu1 %v444_v2 }
  0x46   :  { %222 = vmatmul.mubr.f32.gmra.mxu0 %v40_v53  ;;  %484 = vmatprep.subr.mxu1 %v443_v4 }
  0x47   :  { %227 = vmatprep.mubr.f32.mxu0 %v44_v55  ;;  %485 = vmatpush2.msra.mxu1 %v442_v5 }
  0x48   :  { %486 = vmatprep.subr.mxu1 %v441_v6 }
  0x49   :  { %487 = vmatpush2.msra.mxu1 %v440_v7 }
  0x4a   :  { %228 = vmatmul.mubr.f32.gmra.mxu0 %v43_v59  ;;  %488 = vmatprep.subr.mxu1 %v439_v8 }
  0x4b   :  { %233 = vmatprep.mubr.f32.mxu0 %v47_v61  ;;  %489 = vmatpush2.msra.mxu1 %v438_v9 }
  0x4c   :  { %490 = vmatprep.subr.mxu1 %v437_v10 }
  0x4d   :  { %491 = vmatpush2.msra.mxu1 %v436_v11 }
  0x4e   :  { %234 = vmatmul.mubr.f32.gmra.mxu0 %v46_v1  ;;  %492 = vmatprep.subr.mxu1 %v435_v12 }
  0x4f   :  { %493 = vmatpush2.msra.mxu1 %v434_v13 }
  0x50   :  { %494 = vmatprep.subr.mxu1 %v433_v14 }
  0x51   :  { %495 = vmatpush2.msra.mxu1 %v432_v3 }
  0x52   :  { %496 = vmatprep.subr.mxu1 %v431_v15 }
  0x53   :  { %497 = vmatpush2.msra.mxu1 %v430_v16 }
  0x54   :  { %498 = vmatprep.subr.mxu1 %v429_v17 }
  0x55   :  { %499 = vmatpush2.msra.mxu1 %v428_v18 }
  0x56   :  { %500 = vmatprep.subr.mxu1 %v427_v19 }
  0x57   :  { %501 = vmatpush2.msra.mxu1 %v426_v20 }
  0x58   :  { %502 = vmatprep.subr.mxu1 %v425_v21 }
  0x59   :  { %503 = vmatpush2.msra.mxu1 %v424_v22 }
  0x5a   :  { %504 = vmatprep.subr.mxu1 %v423_v23 }
  0x5b   :  { %505 = vmatpush2.msra.mxu1 %v422_v24 }
  0x5c   :  { %506 = vmatprep.subr.mxu1 %v421_v25 }
  0x5d   :  { %507 = vmatpush2.msra.mxu1 %v420_v26 }
  0x5e   :  { %508 = vmatprep.subr.mxu1 %v419_v27 }
  0x5f   :  { %509 = vmatpush2.msra.mxu1 %v418_v28 }
  0x60   :  { %510 = vmatprep.subr.mxu1 %v417_v29 }
  0x61   :  { %511 = vmatpush2.msra.mxu1 %v416_v30 }
  0xda   :  { %v306_v31 = vpop.f32.mrf.mxu1 }
  0xdc   :  { %v308_v33 = vpop.f32.mrf.mxu1 }
  0xde   :  { %v312_v35 = vpop.f32.mrf.mxu1 }
  0xe0   :  { %v314_v39 = vpop.f32.mrf.mxu1 }
  0xe2   :  { %v318_v45 = vpop.f32.mrf.mxu1 }
  0xe4   :  { %v320_v52 = vpop.f32.mrf.mxu1 }
  0xe6   :  { %v324_v61 = vpop.f32.mrf.mxu1 }
  0xe8   :  { %v326_v6 = vpop.f32.mrf.mxu1 }
 0x102   :  { %v217_v40 = vpop.f32.mrf.mxu0 }
 0x103   :  { %v307_v42 = vadd.f32 %v306_v31, %v217_v40 }
 0x104   :  { %v219_v44 = vpop.f32.mrf.mxu0 }
 0x105   :  { %v309_v46 = vadd.f32 %v308_v33, %v219_v44  ;;  %v1187_v47 = vadd.f32 %v361_v41, %v307_v42 }
 0x106   :  { %v223_v48 = vpop.f32.mrf.mxu0 }
 0x107   :  { %v1189_v49 = vadd.f32 %v365_v43, %v309_v46  ;;  %v313_v50 = vadd.f32 %v312_v35, %v223_v48  ;;  %v376_v55 = vmul.f32 %v1187_v47, %v1187_v47 }
 0x108   :  { %v225_v51 = vpop.f32.mrf.mxu0 }
 0x109   :  { %v315_v53 = vadd.f32 %v314_v39, %v225_v51  ;;  %v377_v54 = vmul.f32 %v1189_v49, %v1189_v49  ;;  %v1195_v56 = vadd.f32 %v361_v41, %v313_v50 }
 0x10a   :  { %v229_v57 = vpop.f32.mrf.mxu0 }
 0x10b   :  { %v1197_v58 = vadd.f32 %v365_v43, %v315_v53  ;;  %v319_v59 = vadd.f32 %v318_v45, %v229_v57  ;;  %512 = vmatprep.mubr.f32.mxu1 %v377_v54  ;;  %v378_v2 = vmul.f32 %v1195_v56, %v1195_v56 }
 0x10c   :  { %v231_v60 = vpop.f32.mrf.mxu0  ;;  %513 = vmatmul.mubr.f32.vlgmr.msra.gmra.mxu1 %v376_v55 }
 0x10d   :  { %v321_v62 = vadd.f32 %v320_v52, %v231_v60  ;;  %v379_v63 = vmul.f32 %v1197_v58, %v1197_v58  ;;  %v1201_v0 = vadd.f32 %v361_v41, %v319_v59 }
 0x10e   :  { %v235_v1 = vpop.f32.mrf.mxu0 }
 0x10f   :  { %v1205_v4 = vadd.f32 %v365_v43, %v321_v62  ;;  %v325_v5 = vadd.f32 %v324_v61, %v235_v1  ;;  %518 = vmatprep.mubr.f32.mxu1 %v379_v63  ;;  %v380_v11 = vmul.f32 %v1201_v0, %v1201_v0 }
 0x110   :  { %v237_v7 = vpop.f32.mrf.mxu0  ;;  %519 = vmatmul.mubr.f32.gmra.mxu1 %v378_v2 }
 0x111   :  { %v327_v8 = vadd.f32 %v326_v6, %v237_v7  ;;  %v381_v9 = vmul.f32 %v1205_v4, %v1205_v4  ;;  %v1209_v10 = vadd.f32 %v361_v41, %v325_v5 }
 0x113   :  { %v1213_v12 = vadd.f32 %v365_v43, %v327_v8  ;;  %524 = vmatprep.mubr.f32.mxu1 %v381_v9  ;;  %v382_v14 = vmul.f32 %v1209_v10, %v1209_v10 }
 0x114   :  { %525 = vmatmul.mubr.f32.gmra.mxu1 %v380_v11 }
 0x115   :  { %v383_v13 = vmul.f32 %v1213_v12, %v1213_v12 }
 0x117   :  { %530 = vmatprep.mubr.f32.mxu1 %v383_v13 }
 0x118   :  { %531 = vmatmul.mubr.f32.gmra.mxu1 %v382_v14 }
 0x1cc   :  { %v514_v3 = vpop.f32.mrf.mxu1 }
 0x1cd   :  { %644 = vrsqrt.f32 %v514_v3  ;;  %v601_v15 = vadd.f32 1.0, %v514_v3  ;;  %vm539_vm2 = vcmp.eq.f32.partialorder %v514_v3, inf  ;;  %vm541_vm3 = vcmp.eq.f32.partialorder %v514_v3, 0.0 }
 0x1ce   :  { %v516_v16 = vpop.f32.mrf.mxu1  ;;  %v542_v32 = vand.u32 2147483648, %v514_v3 }
 0x1cf   :  { %646 = vrsqrt.f32 %v516_v16  ;;  %v602_v17 = vadd.f32 1.0, %v516_v16  ;;  %vm546_vm4 = vcmp.eq.f32.partialorder %v516_v16, inf  ;;  %vm548_vm5 = vcmp.eq.f32.partialorder %v516_v16, 0.0 }
 0x1d0   :  { %v520_v18 = vpop.f32.mrf.mxu1  ;;  %v549_v38 = vand.u32 2147483648, %v516_v16 }
 0x1d1   :  { %648 = vrsqrt.f32 %v520_v18  ;;  %v603_v19 = vadd.f32 1.0, %v520_v18  ;;  %vm553_vm6 = vcmp.eq.f32.partialorder %v520_v18, inf  ;;  %vm555_vm7 = vcmp.eq.f32.partialorder %v520_v18, 0.0 }
 0x1d2   :  { %650 = vrcp.f32 %v601_v15  ;;  %v1219_v20 = vpop.f32.mrf.mxu1  ;;  %v556_v45 = vand.u32 2147483648, %v520_v18 }
 0x1d3   :  { %652 = vrsqrt.f32 %v1219_v20  ;;  %v604_v21 = vadd.f32 1.0, %v1219_v20  ;;  %vm560_vm8 = vcmp.eq.f32.partialorder %v1219_v20, inf  ;;  %vm562_vm9 = vcmp.eq.f32.partialorder %v1219_v20, 0.0 }
 0x1d4   :  { %654 = vrcp.f32 %v602_v17  ;;  %v1223_v22 = vpop.f32.mrf.mxu1 }
 0x1d5   :  { %656 = vrsqrt.f32 %v1223_v22  ;;  %v605_v23 = vadd.f32 1.0, %v1223_v22  ;;  %vm567_vm10 = vcmp.eq.f32.partialorder %v1223_v22, inf  ;;  %vm569_vm11 = vcmp.eq.f32.partialorder %v1223_v22, 0.0 }
 0x1d6   :  { %658 = vrcp.f32 %v603_v19  ;;  %v1227_v24 = vpop.f32.mrf.mxu1  ;;  %v570_v63 = vand.u32 2147483648, %v1223_v22 }
 0x1d7   :  { %660 = vrsqrt.f32 %v1227_v24  ;;  %v606_v26 = vadd.f32 1.0, %v1227_v24  ;;  %vm574_vm12 = vcmp.eq.f32.partialorder %v1227_v24, inf  ;;  %vm576_vm13 = vcmp.eq.f32.partialorder %v1227_v24, 0.0 }
 0x1d8   :  { %662 = vrcp.f32 %v604_v21  ;;  %v1230_v25 = vpop.f32.mrf.mxu1  ;;  %v577_v9 = vand.u32 2147483648, %v1227_v24 }
 0x1d9   :  { %664 = vrsqrt.f32 %v1230_v25  ;;  %v607_v30 = vadd.f32 1.0, %v1230_v25  ;;  %vm581_vm14 = vcmp.eq.f32.partialorder %v1230_v25, inf  ;;  %vm583_vm15 = vcmp.eq.f32.partialorder %v1230_v25, 0.0 }
 0x1da   :  { %v645_v27 = vpop.eup %644  ;;  %666 = vrcp.f32 %v605_v23  ;;  %v1234_v28 = vpop.f32.mrf.mxu1  ;;  %v584_v17 = vand.u32 2147483648, %v1230_v25 }
 0x1db   :  { %v538_v29 = vmul.f32 %v645_v27, %v514_v3  ;;  %668 = vrsqrt.f32 %v1234_v28  ;;  %v608_v33 = vadd.f32 1.0, %v1234_v28  ;;  %vm588_vm0 = vcmp.eq.f32.partialorder %v1234_v28, inf }
 0x1dc   :  { %v647_v31 = vpop.eup %646  ;;  %670 = vrcp.f32 %v606_v26  ;;  %v591_v23 = vand.u32 2147483648, %v1234_v28  ;;  %vm590_vm1 = vcmp.eq.f32.partialorder %v1234_v28, 0.0 }
 0x1dd   :  { %v540_v34 = vsel %vm539_vm2, %v514_v3, %v538_v29  ;;  %v545_v35 = vmul.f32 %v647_v31, %v516_v16  ;;  %672 = vrcp.f32 %v607_v30 }
 0x1de   :  { %v649_v36 = vpop.eup %648  ;;  %v543_v37 = vsel %vm541_vm3, %v542_v32, %v540_v34  ;;  %674 = vrcp.f32 %v608_v33 }
 0x1df   :  { %v651_v39 = vpop.eup %650  ;;  %v593_v40 = vmul.f32 %v543_v37, %v1187_v47  ;;  %v547_v41 = vsel %vm546_vm4, %v516_v16, %v545_v35  ;;  %v552_v42 = vmul.f32 %v649_v36, %v520_v18  ;;  %v563_v47 = vand.u32 2147483648, %v1219_v20 }
 0x1e0   :  { %v653_v43 = vpop.eup %652  ;;  %v550_v44 = vsel %vm548_vm5, %v549_v38, %v547_v41 }
 0x1e1   :  { %v655_v46 = vpop.eup %654  ;;  %v617_v48 = vmul.f32 %v651_v39, %v593_v40  ;;  %v594_v50 = vmul.f32 %v550_v44, %v1189_v49  ;;  %v554_v51 = vsel %vm553_vm6, %v520_v18, %v552_v42  ;;  %v559_v52 = vmul.f32 %v653_v43, %v1219_v20 }
 0x1e2   :  { %v657_v53 = vpop.eup %656  ;;  %v557_v54 = vsel %vm555_vm7, %v556_v45, %v554_v51 }
 0x1e3   :  { %v659_v55 = vpop.eup %658  ;;  %625 = vst [vmem:[%s1300_s4] sm:$0xff] %v617_v48  ;;  %v618_v57 = vmul.f32 %v655_v46, %v594_v50  ;;  %v595_v59 = vmul.f32 %v557_v54, %v1195_v56  ;;  %v561_v49 = vsel %vm560_vm8, %v1219_v20, %v559_v52  ;;  %v566_v60 = vmul.f32 %v657_v53, %v1223_v22 }
 0x1e4   :  { %v661_v61 = vpop.eup %660  ;;  %v564_v62 = vsel %vm562_vm9, %v563_v47, %v561_v49 }
 0x1e5   :  { %v663_v1 = vpop.eup %662  ;;  %626 = vst [vmem:[%s1300_s4 + $0x8] sm:$0xff] %v618_v57  ;;  %v619_v2 = vmul.f32 %v659_v55, %v595_v59  ;;  %v596_v56 = vmul.f32 %v564_v62, %v1197_v58  ;;  %v568_v5 = vsel %vm567_vm10, %v1223_v22, %v566_v60  ;;  %v573_v6 = vmul.f32 %v661_v61, %v1227_v24 }
 0x1e6   :  { %v665_v7 = vpop.eup %664  ;;  %v571_v8 = vsel %vm569_vm11, %v570_v63, %v568_v5 }
 0x1e7   :  { %v667_v11 = vpop.eup %666  ;;  %627 = vst [vmem:[%s1300_s4 + $0x10] sm:$0xff] %v619_v2  ;;  %v620_v13 = vmul.f32 %v663_v1, %v596_v56  ;;  %v597_v58 = vmul.f32 %v571_v8, %v1201_v0  ;;  %v575_v14 = vsel %vm574_vm12, %v1227_v24, %v573_v6  ;;  %v580_v3 = vmul.f32 %v665_v7, %v1230_v25 }
 0x1e8   :  { %v669_v15 = vpop.eup %668  ;;  %v578_v16 = vsel %vm576_vm13, %v577_v9, %v575_v14 }
 0x1e9   :  { %628 = vst [vmem:[%s1300_s4 + $0x18] sm:$0xff] %v620_v13  ;;  %v621_v18 = vmul.f32 %v667_v11, %v597_v58  ;;  %v598_v19 = vmul.f32 %v578_v16, %v1205_v4  ;;  %v582_v0 = vsel %vm581_vm14, %v1230_v25, %v580_v3  ;;  %v587_v20 = vmul.f32 %v669_v15, %v1234_v28  ;;  %v671_v21 = vpop.eup %670 }
 0x1ea   :  { %v585_v22 = vsel %vm583_vm15, %v584_v17, %v582_v0  ;;  %v673_v4 = vpop.eup %672 }
 0x1eb   :  { %629 = vst [vmem:[%s1300_s4 + $0x20] sm:$0xff] %v621_v18  ;;  %v622_v24 = vmul.f32 %v671_v21, %v598_v19  ;;  %v599_v26 = vmul.f32 %v585_v22, %v1209_v10  ;;  %v589_v27 = vsel %vm588_vm0, %v1234_v28, %v587_v20  ;;  %v675_v29 = vpop.eup %674 }
 0x1ec   :  { %v592_v25 = vsel %vm590_vm1, %v591_v23, %v589_v27 }
 0x1ed   :  { %630 = vst [vmem:[%s1300_s4 + $0x28] sm:$0xff] %v622_v24  ;;  %v623_v30 = vmul.f32 %v673_v4, %v599_v26  ;;  %v600_v31 = vmul.f32 %v592_v25, %v1213_v12 }
 0x1ef   :  { %631 = vst [vmem:[%s1300_s4 + $0x30] sm:$0xff] %v623_v30  ;;  %v624_v32 = vmul.f32 %v675_v29, %v600_v31 }
 0x1f1   :  { %632 = vst [vmem:[%s1300_s4 + $0x38] sm:$0xff] %v624_v32 }

</bundles_post_ra>
